<compile_context>
chip_gen: v6e
topology: v6e:2x2x1
jax: 0.10.0
libtpu: 0.0.40
codegen_flags: <defaults>
</compile_context>

<pallas_src>
import functools

import jax
import jax.numpy as jnp
from jax.experimental import pallas as pl
from jax.experimental.pallas import tpu as pltpu


# ----------------------------------------------------------------------------
# Kernel 1: per-point scores, one batch element per grid step (native layout).
#   y       = relu(W @ Z_b + bias)          (C, N)   MXU
#   vec     = max_n y                       (C, 1)   XLU lane-reduce
#   weights = sum_c Z_b * vec               (1, N)   VPU + sublane reduce
#   scores  = sigmoid(weights)              (1, N)   EUP exp + exact divide
# ----------------------------------------------------------------------------
def score_kernel(feats_ref, w_ref, b_ref, scores_ref):
    z = feats_ref[0]                        # (C, N)
    w = w_ref[...]                          # (C, C)
    bias = b_ref[...]                       # (C, 1)

    # 1x1 conv as a single MXU matmul for this batch element.
    y = jnp.dot(w, z, preferred_element_type=jnp.float32) + bias
    y = jnp.maximum(y, 0.0)                 # ReLU

    vec = jnp.max(y, axis=1, keepdims=True)             # (C, 1) channel max
    weights = jnp.sum(z * vec, axis=0, keepdims=True)    # (1, N)

    # Exact sigmoid (no approx reciprocal): scores feed top_k downstream.
    scores_ref[0] = 1.0 / (1.0 + jnp.exp(-weights))


# ----------------------------------------------------------------------------
# Kernel 2: aggregate(xyz, node, features, k), `bblk` batch elements per step.
#   For each node m: find the k nearest input points (squared L2) and take the
#   elementwise max of their feature vectors.  Distances and the per-iteration
#   one-hot feature gather run on the MXU; selection math is (M, N) lane-dense.
# ----------------------------------------------------------------------------
def agg_kernel(xyz_ref, node_ref, feats_ref, out_ref, *, k, bblk, s):
    # xyz_ref:  (bblk, 3, N)   node_ref: (bblk, 3, S)   feats_ref: (bblk, C, N)
    # out_ref:  (1, C, bblk*S) lane-dense slab; batch bi occupies cols [bi*S,(bi+1)*S)
    for bi in range(bblk):                   # static, small (<= 8)
        xyz = xyz_ref[bi]                    # (3, N)
        node = node_ref[bi]                  # (3, S)
        feats = feats_ref[bi]                # (C, N)
        C, N = feats.shape

        # Squared distances, lane-dense (S, N):
        #   d[m, n] = |xyz_n|^2 - 2 <node_m, xyz_n>
        # (|node_m|^2 is constant per row m, hence irrelevant to the per-row
        #  argmin over n; keep this invariant if full distances are ever needed.)
        cross = jax.lax.dot_general(
            node, xyz, dimension_numbers=(((0,), (0,)), ((), ())),
            preferred_element_type=jnp.float32)               # (S, N)
        xyz_sq = jnp.sum(xyz * xyz, axis=0, keepdims=True)    # (1, N)
        d = xyz_sq - 2.0 * cross                               # (S, N)

        n_iota = jax.lax.broadcasted_iota(jnp.int32, d.shape, 1)

        def body(_, carry):
            dcur, fmax = carry
            # per-row argmin over points with smallest-index tie-break
            dmin = jnp.min(dcur, axis=1, keepdims=True)        # (S, 1)
            is_min = dcur <= dmin
            sel_idx = jnp.min(jnp.where(is_min, n_iota, N),
                              axis=1, keepdims=True)           # (S, 1)
            sel = n_iota == sel_idx                             # (S, N) exact one-hot
            # one-hot column gather on the MXU: contract over N -> (C, S)
            feat_sel = jax.lax.dot_general(
                feats, sel.astype(feats.dtype),
                dimension_numbers=(((1,), (1,)), ((), ())),
                preferred_element_type=jnp.float32)
            fmax = jnp.maximum(fmax, feat_sel)
            dcur = jnp.where(sel, jnp.float32(jnp.inf), dcur)   # exclude chosen
            return dcur, fmax

        fmax0 = jnp.full((C, node.shape[1]), -jnp.inf, dtype=jnp.float32)
        # k is a small compile-time constant: unroll so the LLO scheduler
        # overlaps iteration i+1's XLU reductions with iteration i's MXU gather.
        _, fmax = jax.lax.fori_loop(0, k, body, (d, fmax0), unroll=True)

        out_ref[0, :, bi * s:(bi + 1) * s] = fmax.astype(out_ref.dtype)


# ----------------------------------------------------------------------------
# Helpers
# ----------------------------------------------------------------------------
def _pick_block_batch(batch, s):
    """Pack batch elements per agg grid step so the (C, bblk*S) output block is
    lane-dense, while keeping the statically unrolled trace small."""
    best = 1
    for d in range(1, batch + 1):
        if batch % d == 0 and d * s <= 512 and d <= 8:
            best = d
    return best


def _vmem_limit_bytes(*blocks):
    """Scoped-VMEM request from actual block sizes (double-buffered) + headroom."""
    total = 0
    for shape, dtype in blocks:
        n = 1
        for dim in shape:
            n *= dim
        total += 2 * n * jnp.dtype(dtype).itemsize       # 2x: double-buffering
    limit = 2 * total + (1 << 20)                          # 2x headroom + 1 MiB
    return int(min(64 * 2**20, max(32 * 2**20, limit)))    # safe on v5e/v6e/v7x


# ----------------------------------------------------------------------------
# Wrapper: full GDPool.forward (truncate=False path, eval mode)
# ----------------------------------------------------------------------------
def gdpool_forward(input_coords, input_feats, proj_w, proj_b,
                   num_sample, num_agg):
    B, C, N = input_feats.shape
    D = input_coords.shape[1]              # 3
    S = num_sample
    assert num_agg <= N, "num_agg must not exceed the number of input points"

    # ---- per-point scores (Pallas, grid over batch, native layout) ----
    score_vmem = _vmem_limit_bytes(
        ((1, C, N), jnp.float32), ((C, C), jnp.float32),
        ((C, 1), jnp.float32), ((1, 1, N), jnp.float32))
    scores3 = pl.pallas_call(
        score_kernel,
        out_shape=jax.ShapeDtypeStruct((B, 1, N), jnp.float32),
        grid=(B,),
        in_specs=[
            pl.BlockSpec((1, C, N), lambda b: (b, 0, 0)),
            pl.BlockSpec((C, C), lambda b: (0, 0)),
            pl.BlockSpec((C, 1), lambda b: (0, 0)),
        ],
        out_specs=pl.BlockSpec((1, 1, N), lambda b: (b, 0, 0)),
        compiler_params=pltpu.CompilerParams(
            dimension_semantics=("parallel",),
            vmem_limit_bytes=score_vmem),
    )(input_feats, proj_w, proj_b)
    scores = scores3.reshape(B, N)                              # (B, N)

    # ---- top-k selection + gathers (plain JAX: data-dependent indexing) ----
    values, idx = jax.lax.top_k(scores, S)                      # (B, S)
    idx_c = jnp.broadcast_to(idx[:, None, :], (B, D, S))
    idx_f = jnp.broadcast_to(idx[:, None, :], (B, C, S))
    pool_coords_static = jnp.take_along_axis(input_coords, idx_c, axis=2)  # (B, 3, S)
    pool_feats_static = jnp.take_along_axis(input_feats, idx_f, axis=2)    # (B, C, S)
    values3 = values[:, None, :]                                # (B, 1, S)

    # Trivial elementwise scaling: left to XLA (fuses with the gathers).
    pool_feats_scaled = pool_feats_static * values3
    pool_coords = pool_coords_static * values3

    # ---- local aggregation (Pallas, bblk batch elements per grid step) ----
    if num_agg > 0:
        bblk = _pick_block_batch(B, S)
        G = B // bblk
        agg_vmem = _vmem_limit_bytes(
            ((bblk, D, N), jnp.float32), ((bblk, D, S), jnp.float32),
            ((bblk, C, N), jnp.float32), ((1, C, bblk * S), jnp.float32))
        agg_packed = pl.pallas_call(
            functools.partial(agg_kernel, k=num_agg, bblk=bblk, s=S),
            out_shape=jax.ShapeDtypeStruct((G, C, bblk * S), jnp.float32),
            grid=(G,),
            in_specs=[
                pl.BlockSpec((bblk, D, N), lambda g: (g, 0, 0)),
                pl.BlockSpec((bblk, D, S), lambda g: (g, 0, 0)),
                pl.BlockSpec((bblk, C, N), lambda g: (g, 0, 0)),
            ],
            out_specs=pl.BlockSpec((1, C, bblk * S), lambda g: (g, 0, 0)),
            # groups are independent: lets v7x shard across its 2 TCs
            compiler_params=pltpu.CompilerParams(
                dimension_semantics=("parallel",),
                vmem_limit_bytes=agg_vmem),
        )(input_coords, pool_coords_static, input_feats)
        # un-pack the lane-dense (G, C, bblk*S) slab -> (B, C, S)  (small tensor)
        agg_feats = (agg_packed.reshape(G, C, bblk, S)
                     .transpose(0, 2, 1, 3)
                     .reshape(B, C, S))
        pool_feats = jnp.concatenate([pool_feats_scaled, agg_feats], axis=1)
    else:
        # matches reference: cat((pool_feats, pool_feats), dim=1) with scaled feats
        pool_feats = jnp.concatenate([pool_feats_scaled, pool_feats_scaled], axis=1)

    # truncate=False -> no extra conv/BN/ReLU branch
    return pool_coords_static, pool_coords, pool_feats, None


if __name__ == "__main__":
    # small shapes consistent with the module's forward
    B, C, N = 2, 8, 64
    NUM_SAMPLE, NUM_AGG = 16, 4

    key = jax.random.PRNGKey(0)
    k1, k2, k3, k4 = jax.random.split(key, 4)
    input_coords = jax.random.normal(k1, (B, 3, N), jnp.float32)
    input_feats = jax.random.normal(k2, (B, C, N), jnp.float32)

    # deterministic Conv1d(C, C, 1) parameters (PyTorch-style uniform init)
    bound = 1.0 / (C ** 0.5)
    proj_w = jax.random.uniform(k3, (C, C), jnp.float32, -bound, bound)
    proj_b = jax.random.uniform(k4, (C, 1), jnp.float32, -bound, bound)

    fwd = jax.jit(gdpool_forward, static_argnums=(4, 5))
    pool_coords_static, pool_coords, pool_feats, _ = fwd(
        input_coords, input_feats, proj_w, proj_b, NUM_SAMPLE, NUM_AGG)
    jax.block_until_ready((pool_coords_static, pool_coords, pool_feats))

    assert pool_coords_static.shape == (B, 3, NUM_SAMPLE)
    assert pool_coords.shape == (B, 3, NUM_SAMPLE)
    assert pool_feats.shape == (B, 2 * C, NUM_SAMPLE)
    assert bool(jnp.all(jnp.isfinite(pool_feats)))
    print("KERNEL_OK")
</pallas_src>

<mosaic_0001>
module attributes {stable_mosaic.version = 11 : i64} {
  func.func @score_kernel(%arg0: i32, %arg1: memref<1x8x64xf32, #tpu.memory_space<vmem>>, %arg2: memref<8x8xf32, #tpu.memory_space<vmem>>, %arg3: memref<8x1xf32, #tpu.memory_space<vmem>>, %arg4: memref<1x1x64xf32, #tpu.memory_space<vmem>>) attributes {dimension_semantics = [#tpu.dimension_semantics<parallel>], iteration_bounds = array<i64: 2>, scalar_prefetch = 0 : i64, scratch_operands = 0 : i64, tpu.core_type = #tpu.core_type<tc>, window_params = [{transform_indices = @transform_0, window_bounds = array<i64: 1, 8, 64>}, {pipeline_mode = #tpu.pipeline_mode<synchronous>, transform_indices = @transform_1, window_bounds = array<i64: 8, 8>}, {pipeline_mode = #tpu.pipeline_mode<synchronous>, transform_indices = @transform_2, window_bounds = array<i64: 8, 1>}, {transform_indices = @transform_3, window_bounds = array<i64: 1, 1, 64>}]} {
    %c0 = arith.constant 0 : index
    %c0_0 = arith.constant 0 : index
    %c0_1 = arith.constant 0 : index
    %0 = vector.load %arg1[%c0, %c0_0, %c0_1] : memref<1x8x64xf32, #tpu.memory_space<vmem>>, vector<1x8x64xf32>
    %1 = vector.shape_cast %0 : vector<1x8x64xf32> to vector<8x64xf32>
    %c0_2 = arith.constant 0 : index
    %c0_3 = arith.constant 0 : index
    %2 = vector.load %arg2[%c0_2, %c0_3] : memref<8x8xf32, #tpu.memory_space<vmem>>, vector<8x8xf32>
    %c0_4 = arith.constant 0 : index
    %c0_5 = arith.constant 0 : index
    %3 = vector.load %arg3[%c0_4, %c0_5] : memref<8x1xf32, #tpu.memory_space<vmem>>, vector<8x1xf32>
    %cst = arith.constant dense<0.000000e+00> : vector<8x64xf32>
    %4 = tpu.matmul %2, %1, %cst {dimension_numbers = #tpu.dot_dimension_numbers<[1], [0], [0], [1], [0, 0, 1, 1], [], []>} : vector<8x8xf32>, vector<8x64xf32>, vector<8x64xf32> -> vector<8x64xf32>
    %5 = vector.broadcast %3 : vector<8x1xf32> to vector<8x64xf32>
    %6 = arith.addf %4, %5 : vector<8x64xf32>
    %cst_6 = arith.constant 0.000000e+00 : f32
    %7 = vector.broadcast %cst_6 : f32 to vector<8x64xf32>
    %8 = arith.maximumf %6, %7 : vector<8x64xf32>
    %cst_7 = arith.constant dense<0xFF800000> : vector<8xf32>
    %9 = vector.multi_reduction <maximumf>, %8, %cst_7 [1] : vector<8x64xf32> to vector<8xf32>
    %10 = vector.shape_cast %9 : vector<8xf32> to vector<8x1xf32>
    %11 = vector.broadcast %10 : vector<8x1xf32> to vector<8x64xf32>
    %12 = arith.mulf %1, %11 : vector<8x64xf32>
    %cst_8 = arith.constant dense<0.000000e+00> : vector<64xf32>
    %13 = vector.multi_reduction <add>, %12, %cst_8 [0] : vector<8x64xf32> to vector<64xf32>
    %14 = vector.shape_cast %13 : vector<64xf32> to vector<1x64xf32>
    %cst_9 = arith.constant 0.000000e+00 : f32
    %15 = vector.broadcast %cst_9 : f32 to vector<1x64xf32>
    %16 = arith.subf %15, %14 : vector<1x64xf32>
    %17 = math.exp %16 : vector<1x64xf32>
    %cst_10 = arith.constant 1.000000e+00 : f32
    %18 = vector.broadcast %cst_10 : f32 to vector<1x64xf32>
    %19 = arith.addf %18, %17 : vector<1x64xf32>
    %cst_11 = arith.constant 1.000000e+00 : f32
    %20 = vector.broadcast %cst_11 : f32 to vector<1x64xf32>
    %21 = arith.divf %20, %19 : vector<1x64xf32>
    %c0_12 = arith.constant 0 : index
    %c0_13 = arith.constant 0 : index
    %c0_14 = arith.constant 0 : index
    %22 = vector.load %arg4[%c0_12, %c0_13, %c0_14] : memref<1x1x64xf32, #tpu.memory_space<vmem>>, vector<1x1x64xf32>
    %23 = vector.shape_cast %22 : vector<1x1x64xf32> to vector<1x64xf32>
    %24 = vector.shape_cast %21 : vector<1x64xf32> to vector<1x1x64xf32>
    tpu.vector_store %arg4[%c0_12, %c0_13, %c0_14], %24 {strides = array<i32>} : memref<1x1x64xf32, #tpu.memory_space<vmem>>, vector<1x1x64xf32>,
    return
  }
  func.func @transform_0(%arg0: i32) -> (i32, i32, i32) {
    %c0_i32 = arith.constant 0 : i32
    %c0_i32_0 = arith.constant 0 : i32
    %c0_i32_1 = arith.constant 0 : i32
    return %arg0, %c0_i32, %c0_i32_0 : i32, i32, i32
  }
  func.func @transform_1(%arg0: i32) -> (i32, i32) {
    %c0_i32 = arith.constant 0 : i32
    %c0_i32_0 = arith.constant 0 : i32
    %c0_i32_1 = arith.constant 0 : i32
    return %c0_i32, %c0_i32_0 : i32, i32
  }
  func.func @transform_2(%arg0: i32) -> (i32, i32) {
    %c0_i32 = arith.constant 0 : i32
    %c0_i32_0 = arith.constant 0 : i32
    %c0_i32_1 = arith.constant 0 : i32
    return %c0_i32, %c0_i32_0 : i32, i32
  }
  func.func @transform_3(%arg0: i32) -> (i32, i32, i32) {
    %c0_i32 = arith.constant 0 : i32
    %c0_i32_0 = arith.constant 0 : i32
    %c0_i32_1 = arith.constant 0 : i32
    return %arg0, %c0_i32, %c0_i32_0 : i32, i32, i32
  }
}

module attributes {stable_mosaic.version = 11 : i64} {
  func.func @agg_kernel(%arg0: i32, %arg1: memref<2x3x64xf32, #tpu.memory_space<vmem>>, %arg2: memref<2x3x16xf32, #tpu.memory_space<vmem>>, %arg3: memref<2x8x64xf32, #tpu.memory_space<vmem>>, %arg4: memref<1x8x32xf32, #tpu.memory_space<vmem>>) attributes {dimension_semantics = [#tpu.dimension_semantics<parallel>], iteration_bounds = array<i64: 1>, scalar_prefetch = 0 : i64, scratch_operands = 0 : i64, tpu.core_type = #tpu.core_type<tc>, window_params = [{transform_indices = @transform_0, window_bounds = array<i64: 2, 3, 64>}, {transform_indices = @transform_1, window_bounds = array<i64: 2, 3, 16>}, {transform_indices = @transform_2, window_bounds = array<i64: 2, 8, 64>}, {transform_indices = @transform_3, window_bounds = array<i64: 1, 8, 32>}]} {
    %c0 = arith.constant 0 : index
    %c0_0 = arith.constant 0 : index
    %c0_1 = arith.constant 0 : index
    %0 = vector.load %arg1[%c0, %c0_0, %c0_1] : memref<2x3x64xf32, #tpu.memory_space<vmem>>, vector<1x3x64xf32>
    %1 = vector.shape_cast %0 : vector<1x3x64xf32> to vector<3x64xf32>
    %c0_2 = arith.constant 0 : index
    %c0_3 = arith.constant 0 : index
    %c0_4 = arith.constant 0 : index
    %2 = vector.load %arg2[%c0_2, %c0_3, %c0_4] : memref<2x3x16xf32, #tpu.memory_space<vmem>>, vector<1x3x16xf32>
    %3 = vector.shape_cast %2 : vector<1x3x16xf32> to vector<3x16xf32>
    %c0_5 = arith.constant 0 : index
    %c0_6 = arith.constant 0 : index
    %c0_7 = arith.constant 0 : index
    %4 = vector.load %arg3[%c0_5, %c0_6, %c0_7] : memref<2x8x64xf32, #tpu.memory_space<vmem>>, vector<1x8x64xf32>
    %5 = vector.shape_cast %4 : vector<1x8x64xf32> to vector<8x64xf32>
    %cst = arith.constant dense<0.000000e+00> : vector<16x64xf32>
    %6 = tpu.matmul %3, %1, %cst {dimension_numbers = #tpu.dot_dimension_numbers<[0], [0], [1], [1], [0, 1, 1, 1], [], []>} : vector<3x16xf32>, vector<3x64xf32>, vector<16x64xf32> -> vector<16x64xf32>
    %7 = arith.mulf %1, %1 : vector<3x64xf32>
    %cst_8 = arith.constant dense<0.000000e+00> : vector<64xf32>
    %8 = vector.multi_reduction <add>, %7, %cst_8 [0] : vector<3x64xf32> to vector<64xf32>
    %9 = vector.shape_cast %8 : vector<64xf32> to vector<1x64xf32>
    %cst_9 = arith.constant 2.000000e+00 : f32
    %10 = vector.broadcast %cst_9 : f32 to vector<16x64xf32>
    %11 = arith.mulf %10, %6 : vector<16x64xf32>
    %12 = vector.broadcast %9 : vector<1x64xf32> to vector<16x64xf32>
    %13 = arith.subf %12, %11 : vector<16x64xf32>
    %14 = tpu.iota {dimensions = array<i32: 1>} : vector<16x64xi32>
    %cst_10 = arith.constant 0xFF800000 : f32
    %15 = vector.broadcast %cst_10 : f32 to vector<8x16xf32>
    %c0_i32 = arith.constant 0 : i32
    %cst_11 = arith.constant dense<0x7F800000> : vector<16xf32>
    %16 = vector.multi_reduction <minimumf>, %13, %cst_11 [1] : vector<16x64xf32> to vector<16xf32>
    %17 = vector.shape_cast %16 : vector<16xf32> to vector<16x1xf32>
    %18 = vector.broadcast %17 : vector<16x1xf32> to vector<16x64xf32>
    %19 = arith.cmpf ole, %13, %18 : vector<16x64xf32>
    %c64_i32 = arith.constant 64 : i32
    %20 = vector.broadcast %c64_i32 : i32 to vector<16x64xi32>
    %21 = arith.select %19, %14, %20 : vector<16x64xi1>, vector<16x64xi32>
    %cst_12 = arith.constant dense<2147483647> : vector<16xi32>
    %22 = vector.multi_reduction <minsi>, %21, %cst_12 [1] : vector<16x64xi32> to vector<16xi32>
    %23 = vector.shape_cast %22 : vector<16xi32> to vector<16x1xi32>
    %24 = vector.broadcast %23 : vector<16x1xi32> to vector<16x64xi32>
    %25 = arith.cmpi eq, %14, %24 : vector<16x64xi32>
    %26 = arith.extui %25 : vector<16x64xi1> to vector<16x64xi32>
    %27 = arith.sitofp %26 : vector<16x64xi32> to vector<16x64xf32>
    %cst_13 = arith.constant dense<0.000000e+00> : vector<8x16xf32>
    %28 = tpu.matmul %5, %27, %cst_13 {dimension_numbers = #tpu.dot_dimension_numbers<[1], [1], [0], [0], [0, 0, 1, 0], [], []>} : vector<8x64xf32>, vector<16x64xf32>, vector<8x16xf32> -> vector<8x16xf32>
    %29 = arith.maximumf %15, %28 : vector<8x16xf32>
    %cst_14 = arith.constant 0x7F800000 : f32
    %30 = vector.broadcast %cst_14 : f32 to vector<16x64xf32>
    %31 = arith.select %25, %30, %13 : vector<16x64xi1>, vector<16x64xf32>
    %c1_i32 = arith.constant 1 : i32
    %cst_15 = arith.constant dense<0x7F800000> : vector<16xf32>
    %32 = vector.multi_reduction <minimumf>, %31, %cst_15 [1] : vector<16x64xf32> to vector<16xf32>
    %33 = vector.shape_cast %32 : vector<16xf32> to vector<16x1xf32>
    %34 = vector.broadcast %33 : vector<16x1xf32> to vector<16x64xf32>
    %35 = arith.cmpf ole, %31, %34 : vector<16x64xf32>
    %c64_i32_16 = arith.constant 64 : i32
    %36 = vector.broadcast %c64_i32_16 : i32 to vector<16x64xi32>
    %37 = arith.select %35, %14, %36 : vector<16x64xi1>, vector<16x64xi32>
    %cst_17 = arith.constant dense<2147483647> : vector<16xi32>
    %38 = vector.multi_reduction <minsi>, %37, %cst_17 [1] : vector<16x64xi32> to vector<16xi32>
    %39 = vector.shape_cast %38 : vector<16xi32> to vector<16x1xi32>
    %40 = vector.broadcast %39 : vector<16x1xi32> to vector<16x64xi32>
    %41 = arith.cmpi eq, %14, %40 : vector<16x64xi32>
    %42 = arith.extui %41 : vector<16x64xi1> to vector<16x64xi32>
    %43 = arith.sitofp %42 : vector<16x64xi32> to vector<16x64xf32>
    %cst_18 = arith.constant dense<0.000000e+00> : vector<8x16xf32>
    %44 = tpu.matmul %5, %43, %cst_18 {dimension_numbers = #tpu.dot_dimension_numbers<[1], [1], [0], [0], [0, 0, 1, 0], [], []>} : vector<8x64xf32>, vector<16x64xf32>, vector<8x16xf32> -> vector<8x16xf32>
    %45 = arith.maximumf %29, %44 : vector<8x16xf32>
    %cst_19 = arith.constant 0x7F800000 : f32
    %46 = vector.broadcast %cst_19 : f32 to vector<16x64xf32>
    %47 = arith.select %41, %46, %31 : vector<16x64xi1>, vector<16x64xf32>
    %c2_i32 = arith.constant 2 : i32
    %cst_20 = arith.constant dense<0x7F800000> : vector<16xf32>
    %48 = vector.multi_reduction <minimumf>, %47, %cst_20 [1] : vector<16x64xf32> to vector<16xf32>
    %49 = vector.shape_cast %48 : vector<16xf32> to vector<16x1xf32>
    %50 = vector.broadcast %49 : vector<16x1xf32> to vector<16x64xf32>
    %51 = arith.cmpf ole, %47, %50 : vector<16x64xf32>
    %c64_i32_21 = arith.constant 64 : i32
    %52 = vector.broadcast %c64_i32_21 : i32 to vector<16x64xi32>
    %53 = arith.select %51, %14, %52 : vector<16x64xi1>, vector<16x64xi32>
    %cst_22 = arith.constant dense<2147483647> : vector<16xi32>
    %54 = vector.multi_reduction <minsi>, %53, %cst_22 [1] : vector<16x64xi32> to vector<16xi32>
    %55 = vector.shape_cast %54 : vector<16xi32> to vector<16x1xi32>
    %56 = vector.broadcast %55 : vector<16x1xi32> to vector<16x64xi32>
    %57 = arith.cmpi eq, %14, %56 : vector<16x64xi32>
    %58 = arith.extui %57 : vector<16x64xi1> to vector<16x64xi32>
    %59 = arith.sitofp %58 : vector<16x64xi32> to vector<16x64xf32>
    %cst_23 = arith.constant dense<0.000000e+00> : vector<8x16xf32>
    %60 = tpu.matmul %5, %59, %cst_23 {dimension_numbers = #tpu.dot_dimension_numbers<[1], [1], [0], [0], [0, 0, 1, 0], [], []>} : vector<8x64xf32>, vector<16x64xf32>, vector<8x16xf32> -> vector<8x16xf32>
    %61 = arith.maximumf %45, %60 : vector<8x16xf32>
    %cst_24 = arith.constant 0x7F800000 : f32
    %62 = vector.broadcast %cst_24 : f32 to vector<16x64xf32>
    %63 = arith.select %57, %62, %47 : vector<16x64xi1>, vector<16x64xf32>
    %c3_i32 = arith.constant 3 : i32
    %cst_25 = arith.constant dense<0x7F800000> : vector<16xf32>
    %64 = vector.multi_reduction <minimumf>, %63, %cst_25 [1] : vector<16x64xf32> to vector<16xf32>
    %65 = vector.shape_cast %64 : vector<16xf32> to vector<16x1xf32>
    %66 = vector.broadcast %65 : vector<16x1xf32> to vector<16x64xf32>
    %67 = arith.cmpf ole, %63, %66 : vector<16x64xf32>
    %c64_i32_26 = arith.constant 64 : i32
    %68 = vector.broadcast %c64_i32_26 : i32 to vector<16x64xi32>
    %69 = arith.select %67, %14, %68 : vector<16x64xi1>, vector<16x64xi32>
    %cst_27 = arith.constant dense<2147483647> : vector<16xi32>
    %70 = vector.multi_reduction <minsi>, %69, %cst_27 [1] : vector<16x64xi32> to vector<16xi32>
    %71 = vector.shape_cast %70 : vector<16xi32> to vector<16x1xi32>
    %72 = vector.broadcast %71 : vector<16x1xi32> to vector<16x64xi32>
    %73 = arith.cmpi eq, %14, %72 : vector<16x64xi32>
    %74 = arith.extui %73 : vector<16x64xi1> to vector<16x64xi32>
    %75 = arith.sitofp %74 : vector<16x64xi32> to vector<16x64xf32>
    %cst_28 = arith.constant dense<0.000000e+00> : vector<8x16xf32>
    %76 = tpu.matmul %5, %75, %cst_28 {dimension_numbers = #tpu.dot_dimension_numbers<[1], [1], [0], [0], [0, 0, 1, 0], [], []>} : vector<8x64xf32>, vector<16x64xf32>, vector<8x16xf32> -> vector<8x16xf32>
    %77 = arith.maximumf %61, %76 : vector<8x16xf32>
    %cst_29 = arith.constant 0x7F800000 : f32
    %78 = vector.broadcast %cst_29 : f32 to vector<16x64xf32>
    %79 = arith.select %73, %78, %63 : vector<16x64xi1>, vector<16x64xf32>
    %c0_30 = arith.constant 0 : index
    %c0_31 = arith.constant 0 : index
    %c0_32 = arith.constant 0 : index
    %80 = vector.load %arg4[%c0_30, %c0_31, %c0_32] : memref<1x8x32xf32, #tpu.memory_space<vmem>>, vector<1x8x16xf32>
    %81 = vector.shape_cast %80 : vector<1x8x16xf32> to vector<8x16xf32>
    %82 = vector.shape_cast %77 : vector<8x16xf32> to vector<1x8x16xf32>
    tpu.vector_store %arg4[%c0_30, %c0_31, %c0_32], %82 {strides = array<i32>} : memref<1x8x32xf32, #tpu.memory_space<vmem>>, vector<1x8x16xf32>,
    %c1 = arith.constant 1 : index
    %c0_33 = arith.constant 0 : index
    %c0_34 = arith.constant 0 : index
    %83 = vector.load %arg1[%c1, %c0_33, %c0_34] : memref<2x3x64xf32, #tpu.memory_space<vmem>>, vector<1x3x64xf32>
    %84 = vector.shape_cast %83 : vector<1x3x64xf32> to vector<3x64xf32>
    %c1_35 = arith.constant 1 : index
    %c0_36 = arith.constant 0 : index
    %c0_37 = arith.constant 0 : index
    %85 = vector.load %arg2[%c1_35, %c0_36, %c0_37] : memref<2x3x16xf32, #tpu.memory_space<vmem>>, vector<1x3x16xf32>
    %86 = vector.shape_cast %85 : vector<1x3x16xf32> to vector<3x16xf32>
    %c1_38 = arith.constant 1 : index
    %c0_39 = arith.constant 0 : index
    %c0_40 = arith.constant 0 : index
    %87 = vector.load %arg3[%c1_38, %c0_39, %c0_40] : memref<2x8x64xf32, #tpu.memory_space<vmem>>, vector<1x8x64xf32>
    %88 = vector.shape_cast %87 : vector<1x8x64xf32> to vector<8x64xf32>
    %cst_41 = arith.constant dense<0.000000e+00> : vector<16x64xf32>
    %89 = tpu.matmul %86, %84, %cst_41 {dimension_numbers = #tpu.dot_dimension_numbers<[0], [0], [1], [1], [0, 1, 1, 1], [], []>} : vector<3x16xf32>, vector<3x64xf32>, vector<16x64xf32> -> vector<16x64xf32>
    %90 = arith.mulf %84, %84 : vector<3x64xf32>
    %cst_42 = arith.constant dense<0.000000e+00> : vector<64xf32>
    %91 = vector.multi_reduction <add>, %90, %cst_42 [0] : vector<3x64xf32> to vector<64xf32>
    %92 = vector.shape_cast %91 : vector<64xf32> to vector<1x64xf32>
    %cst_43 = arith.constant 2.000000e+00 : f32
    %93 = vector.broadcast %cst_43 : f32 to vector<16x64xf32>
    %94 = arith.mulf %93, %89 : vector<16x64xf32>
    %95 = vector.broadcast %92 : vector<1x64xf32> to vector<16x64xf32>
    %96 = arith.subf %95, %94 : vector<16x64xf32>
    %97 = tpu.iota {dimensions = array<i32: 1>} : vector<16x64xi32>
    %cst_44 = arith.constant 0xFF800000 : f32
    %98 = vector.broadcast %cst_44 : f32 to vector<8x16xf32>
    %c0_i32_45 = arith.constant 0 : i32
    %cst_46 = arith.constant dense<0x7F800000> : vector<16xf32>
    %99 = vector.multi_reduction <minimumf>, %96, %cst_46 [1] : vector<16x64xf32> to vector<16xf32>
    %100 = vector.shape_cast %99 : vector<16xf32> to vector<16x1xf32>
    %101 = vector.broadcast %100 : vector<16x1xf32> to vector<16x64xf32>
    %102 = arith.cmpf ole, %96, %101 : vector<16x64xf32>
    %c64_i32_47 = arith.constant 64 : i32
    %103 = vector.broadcast %c64_i32_47 : i32 to vector<16x64xi32>
    %104 = arith.select %102, %97, %103 : vector<16x64xi1>, vector<16x64xi32>
    %cst_48 = arith.constant dense<2147483647> : vector<16xi32>
    %105 = vector.multi_reduction <minsi>, %104, %cst_48 [1] : vector<16x64xi32> to vector<16xi32>
    %106 = vector.shape_cast %105 : vector<16xi32> to vector<16x1xi32>
    %107 = vector.broadcast %106 : vector<16x1xi32> to vector<16x64xi32>
    %108 = arith.cmpi eq, %97, %107 : vector<16x64xi32>
    %109 = arith.extui %108 : vector<16x64xi1> to vector<16x64xi32>
    %110 = arith.sitofp %109 : vector<16x64xi32> to vector<16x64xf32>
    %cst_49 = arith.constant dense<0.000000e+00> : vector<8x16xf32>
    %111 = tpu.matmul %88, %110, %cst_49 {dimension_numbers = #tpu.dot_dimension_numbers<[1], [1], [0], [0], [0, 0, 1, 0], [], []>} : vector<8x64xf32>, vector<16x64xf32>, vector<8x16xf32> -> vector<8x16xf32>
    %112 = arith.maximumf %98, %111 : vector<8x16xf32>
    %cst_50 = arith.constant 0x7F800000 : f32
    %113 = vector.broadcast %cst_50 : f32 to vector<16x64xf32>
    %114 = arith.select %108, %113, %96 : vector<16x64xi1>, vector<16x64xf32>
    %c1_i32_51 = arith.constant 1 : i32
    %cst_52 = arith.constant dense<0x7F800000> : vector<16xf32>
    %115 = vector.multi_reduction <minimumf>, %114, %cst_52 [1] : vector<16x64xf32> to vector<16xf32>
    %116 = vector.shape_cast %115 : vector<16xf32> to vector<16x1xf32>
    %117 = vector.broadcast %116 : vector<16x1xf32> to vector<16x64xf32>
    %118 = arith.cmpf ole, %114, %117 : vector<16x64xf32>
    %c64_i32_53 = arith.constant 64 : i32
    %119 = vector.broadcast %c64_i32_53 : i32 to vector<16x64xi32>
    %120 = arith.select %118, %97, %119 : vector<16x64xi1>, vector<16x64xi32>
    %cst_54 = arith.constant dense<2147483647> : vector<16xi32>
    %121 = vector.multi_reduction <minsi>, %120, %cst_54 [1] : vector<16x64xi32> to vector<16xi32>
    %122 = vector.shape_cast %121 : vector<16xi32> to vector<16x1xi32>
    %123 = vector.broadcast %122 : vector<16x1xi32> to vector<16x64xi32>
    %124 = arith.cmpi eq, %97, %123 : vector<16x64xi32>
    %125 = arith.extui %124 : vector<16x64xi1> to vector<16x64xi32>
    %126 = arith.sitofp %125 : vector<16x64xi32> to vector<16x64xf32>
    %cst_55 = arith.constant dense<0.000000e+00> : vector<8x16xf32>
    %127 = tpu.matmul %88, %126, %cst_55 {dimension_numbers = #tpu.dot_dimension_numbers<[1], [1], [0], [0], [0, 0, 1, 0], [], []>} : vector<8x64xf32>, vector<16x64xf32>, vector<8x16xf32> -> vector<8x16xf32>
    %128 = arith.maximumf %112, %127 : vector<8x16xf32>
    %cst_56 = arith.constant 0x7F800000 : f32
    %129 = vector.broadcast %cst_56 : f32 to vector<16x64xf32>
    %130 = arith.select %124, %129, %114 : vector<16x64xi1>, vector<16x64xf32>
    %c2_i32_57 = arith.constant 2 : i32
    %cst_58 = arith.constant dense<0x7F800000> : vector<16xf32>
    %131 = vector.multi_reduction <minimumf>, %130, %cst_58 [1] : vector<16x64xf32> to vector<16xf32>
    %132 = vector.shape_cast %131 : vector<16xf32> to vector<16x1xf32>
    %133 = vector.broadcast %132 : vector<16x1xf32> to vector<16x64xf32>
    %134 = arith.cmpf ole, %130, %133 : vector<16x64xf32>
    %c64_i32_59 = arith.constant 64 : i32
    %135 = vector.broadcast %c64_i32_59 : i32 to vector<16x64xi32>
    %136 = arith.select %134, %97, %135 : vector<16x64xi1>, vector<16x64xi32>
    %cst_60 = arith.constant dense<2147483647> : vector<16xi32>
    %137 = vector.multi_reduction <minsi>, %136, %cst_60 [1] : vector<16x64xi32> to vector<16xi32>
    %138 = vector.shape_cast %137 : vector<16xi32> to vector<16x1xi32>
    %139 = vector.broadcast %138 : vector<16x1xi32> to vector<16x64xi32>
    %140 = arith.cmpi eq, %97, %139 : vector<16x64xi32>
    %141 = arith.extui %140 : vector<16x64xi1> to vector<16x64xi32>
    %142 = arith.sitofp %141 : vector<16x64xi32> to vector<16x64xf32>
    %cst_61 = arith.constant dense<0.000000e+00> : vector<8x16xf32>
    %143 = tpu.matmul %88, %142, %cst_61 {dimension_numbers = #tpu.dot_dimension_numbers<[1], [1], [0], [0], [0, 0, 1, 0], [], []>} : vector<8x64xf32>, vector<16x64xf32>, vector<8x16xf32> -> vector<8x16xf32>
    %144 = arith.maximumf %128, %143 : vector<8x16xf32>
    %cst_62 = arith.constant 0x7F800000 : f32
    %145 = vector.broadcast %cst_62 : f32 to vector<16x64xf32>
    %146 = arith.select %140, %145, %130 : vector<16x64xi1>, vector<16x64xf32>
    %c3_i32_63 = arith.constant 3 : i32
    %cst_64 = arith.constant dense<0x7F800000> : vector<16xf32>
    %147 = vector.multi_reduction <minimumf>, %146, %cst_64 [1] : vector<16x64xf32> to vector<16xf32>
    %148 = vector.shape_cast %147 : vector<16xf32> to vector<16x1xf32>
    %149 = vector.broadcast %148 : vector<16x1xf32> to vector<16x64xf32>
    %150 = arith.cmpf ole, %146, %149 : vector<16x64xf32>
    %c64_i32_65 = arith.constant 64 : i32
    %151 = vector.broadcast %c64_i32_65 : i32 to vector<16x64xi32>
    %152 = arith.select %150, %97, %151 : vector<16x64xi1>, vector<16x64xi32>
    %cst_66 = arith.constant dense<2147483647> : vector<16xi32>
    %153 = vector.multi_reduction <minsi>, %152, %cst_66 [1] : vector<16x64xi32> to vector<16xi32>
    %154 = vector.shape_cast %153 : vector<16xi32> to vector<16x1xi32>
    %155 = vector.broadcast %154 : vector<16x1xi32> to vector<16x64xi32>
    %156 = arith.cmpi eq, %97, %155 : vector<16x64xi32>
    %157 = arith.extui %156 : vector<16x64xi1> to vector<16x64xi32>
    %158 = arith.sitofp %157 : vector<16x64xi32> to vector<16x64xf32>
    %cst_67 = arith.constant dense<0.000000e+00> : vector<8x16xf32>
    %159 = tpu.matmul %88, %158, %cst_67 {dimension_numbers = #tpu.dot_dimension_numbers<[1], [1], [0], [0], [0, 0, 1, 0], [], []>} : vector<8x64xf32>, vector<16x64xf32>, vector<8x16xf32> -> vector<8x16xf32>
    %160 = arith.maximumf %144, %159 : vector<8x16xf32>
    %cst_68 = arith.constant 0x7F800000 : f32
    %161 = vector.broadcast %cst_68 : f32 to vector<16x64xf32>
    %162 = arith.select %156, %161, %146 : vector<16x64xi1>, vector<16x64xf32>
    %c0_69 = arith.constant 0 : index
    %c0_70 = arith.constant 0 : index
    %c16 = arith.constant 16 : index
    %163 = vector.load %arg4[%c0_69, %c0_70, %c16] : memref<1x8x32xf32, #tpu.memory_space<vmem>>, vector<1x8x16xf32>
    %164 = vector.shape_cast %163 : vector<1x8x16xf32> to vector<8x16xf32>
    %165 = vector.shape_cast %160 : vector<8x16xf32> to vector<1x8x16xf32>
    tpu.vector_store %arg4[%c0_69, %c0_70, %c16], %165 {strides = array<i32>} : memref<1x8x32xf32, #tpu.memory_space<vmem>>, vector<1x8x16xf32>,
    return
  }
  func.func @transform_0(%arg0: i32) -> (i32, i32, i32) {
    %c0_i32 = arith.constant 0 : i32
    %c0_i32_0 = arith.constant 0 : i32
    %c0_i32_1 = arith.constant 0 : i32
    return %arg0, %c0_i32, %c0_i32_0 : i32, i32, i32
  }
  func.func @transform_1(%arg0: i32) -> (i32, i32, i32) {
    %c0_i32 = arith.constant 0 : i32
    %c0_i32_0 = arith.constant 0 : i32
    %c0_i32_1 = arith.constant 0 : i32
    return %arg0, %c0_i32, %c0_i32_0 : i32, i32, i32
  }
  func.func @transform_2(%arg0: i32) -> (i32, i32, i32) {
    %c0_i32 = arith.constant 0 : i32
    %c0_i32_0 = arith.constant 0 : i32
    %c0_i32_1 = arith.constant 0 : i32
    return %arg0, %c0_i32, %c0_i32_0 : i32, i32, i32
  }
  func.func @transform_3(%arg0: i32) -> (i32, i32, i32) {
    %c0_i32 = arith.constant 0 : i32
    %c0_i32_0 = arith.constant 0 : i32
    %c0_i32_1 = arith.constant 0 : i32
    return %arg0, %c0_i32, %c0_i32_0 : i32, i32, i32
  }
}

</mosaic_0001>

<bundles_post_ra>
// kernel: gdpool_forward.2
= control target key start
LH: loop header
LB: loop body
LE: loop exit
PB: predicated region body
PF: predicated region fallthrough
CT: control target
= control target key end

     0   :  { %8 = vsyncpa [#allocation3], 0  ;;  %s604_s0 = inlined_call_operand.hbm [shape: f32[2,8,64], index: 0, kind: input, shape index: {}]   ;;  %s605_s1 = inlined_call_operand.vmem [shape: f32[8,8], index: 1, kind: input, shape index: {}]   ;;  %s606_s2 = inlined_call_operand.vmem [shape: f32[8,1], index: 2, kind: input, shape index: {}]   ;;  %s607_s3 = inlined_call_operand.vmem [shape: f32[2,1,64], index: 3, kind: output, shape index: {}]  }
   0x1   :  { %10 = vsyncpa [#allocation3 + $0x1], 0  ;;  %s498_s12 = smov 0   ;;  %s500_s13 = smov 0  }
   0x2   :  { %s502_s14 = smov 0   ;;  %s504_s15 = smov 0  }
   0x3 LB: > { %s517_s16 = sadd.s32 4294967295, %s472_s15   ;;  %s520_s17 = sadd.s32 1, %s472_s15   ;;  %s472_s15 = sphi %s504_s15, %s617_s15   ;;  %s468_s14 = sphi %s502_s14, %s616_s14   ;;  %s464_s13 = sphi %s500_s13, %s615_s13   ;;  %s460_s12 = sphi %s498_s12, %s614_s12  }
   0x4   : > { %s20_s18 = ssub.s32 %s472_s15, %s520_s17  ;;  %s23_s19 = sadd.s32 1, %s468_s14 }
   0x5   : > { %p21_p0 = scmp.eq.s32.totalorder %s20_s18, 0  ;;  %p30_p1 = scmp.ne.s32.totalorder %s468_s14, %s464_s13 }
   0x6   : > { %p31_p2 = scmp.eq.s32.totalorder %s472_s15, 0  ;;  %p36_p3 = scmp.ne.s32.totalorder %s464_s13, %s460_s12 }
   0x7   : > { %s530_s20 = scalar_select %p21_p0, %s468_s14, %s23_s19  }
   0x8   : > { %p32_p4 = por %p31_p2, %p30_p1  ;;  %p37_p5 = scmp.eq.s32.totalorder %s517_s16, 0 }
   0x9   : > { %p369_p6 = scmp.lt.s32.totalorder %s472_s15, 2  ;;  %s134_s22 = sand.u32 1, %s468_s14  }
   0xa   : > { %p534_p7 = por %p37_p5, %p36_p3  ;;  %s349_s23 = sshll.u32 %s134_s22, 3 }
   0xb   : > { %s350_s24 = sshll.u32 %s472_s15, 7  ;;  %s138_s28 = scalar_lea.vmem [#allocation2], %s349_s23 }
   0xc   : > { %s609_s21 = scalar_select %p534_p7, 1, 0 }
   0xd   : > { %s543_s27 = scalar_lea.hbm %s604_s0, %s350_s24  ;;  %s145_s29 = sshll.u32 %s138_s28, 4  ;;  %s545_s29 = int_to_ptr.vmem [resolvable:$true] %s145_s29 }
   0xe   : > { %p547_p8 = pnand %p369_p6, %p32_p4  ;;  %s135_s4 = scalar_lea.sflag [#allocation3], %s134_s22 }
   0xf   : > { %s410_s5 = scalar_lea.hbm %s543_s27, 128  ;;  %s415_s8 = scalar_lea.hbm %s604_s0, 256 }
  0x10   : > { %p411_p11 = scmp.ne.s32.totalorder %s543_s27, %s410_s5  ;;  %p412_p12 = pneg %p547_p8 }
  0x11   : > { %p416_p1 = scmp.lt.s32.totalorder %s543_s27, %s604_s0  ;;  %p417_p2 = scmp.lt.s32.totalorder %s415_s8, %s410_s5 }
  0x12   : > { %p413_p13 = pnand %p412_p12, %p411_p11 }
  0x13   : > { %p418_p3 = por %p417_p2, %p416_p1 }
  0x14   : > { %p414_p0 = pneg %p413_p13 }
  0x16   : > { %p419_p4 = pnand %p418_p3, %p414_p0 }
  0x18   : > { %422 = shalt.err (!%p419_p4)
}
  0x19   : > { %s423_s11 = scalar_lea.vmem %s545_s29, 128  ;;  %s474_s12 = smov [#allocation2]  }
  0x1a   : > { %p424_p5 = scmp.ne.s32.totalorder %s545_s29, %s423_s11  ;;  %s428_s18 = sshll.u32 %s474_s12, 4  ;;  %s429_s18 = int_to_ptr.vmem [resolvable:$false] %s428_s18 }
  0x1b   : > { %s430_s19 = scalar_lea.vmem %s429_s18, 256  ;;  %p431_p13 = scmp.lt.s32.totalorder %s545_s29, %s429_s18 }
  0x1c   : > { %p426_p6 = pnand %p424_p5, %p412_p12  ;;  %p432_p9 = scmp.lt.s32.totalorder %s430_s19, %s423_s11 }
  0x1e   : > { %p427_p11 = pneg %p426_p6  ;;  %p433_p10 = por %p432_p9, %p431_p13 }
  0x20   : > { %p434_p7 = pnand %p433_p10, %p427_p11 }
  0x22   : > { %437 = shalt.err (!%p434_p7)
}
  0x23   : > { %368 = dma.hbm_to_vmem [thread:$0]  (!%p547_p8), %s543_s27, 128, %s545_s29, %s135_s4  }
  0x24   : > { %p611_p0 = scmp.lt.s32.totalorder %s472_s15, 3  ;;  %p612_p1 = scmp.ge.s32.totalorder %s472_s15, 1 }
  0x26   : > { %p151_p12 = pnand %p612_p1, %p611_p0 }
  0x27   : > { %s156_s22 = sand.u32 (!%p151_p12), 1, %s464_s13   ;;  %p613_p9 = scmp.ne.s32.totalorder (!%p151_p12), %s609_s21, 0 }
  0x28   : > { %154 = sbr.rel (%p151_p12) target bundleno = 435 (0x1b3), region = 32  ;;  %s352_s23 = sshll.u32 (!%p151_p12), %s156_s22, 3 }
  0x29   : > { %s157_s24 = scalar_lea.sflag (!%p151_p12), [#allocation3], %s156_s22  ;;  %s160_s25 = scalar_lea.vmem (!%p151_p12), [#allocation2], %s352_s23 }
  0x2d   : > { %455 = dma.done.wait (%p613_p9), %s157_s24, 128  }
  0x2e   : > { %457 = vsyncadd (%p613_p9), %s157_s24, 4294967168  ;;  %v475_v0 = vmov 0.0   ;;  %vm476_vm0 = vmmov 0   ;;  %v477_v1 = vmov 0   ;;  %vm192_vm1 = vcmask 64512   ;;  %v184_v2 = vld [vmem:[%s160_s25] sm:$0xff] }
  0x2f   : > { %358 = vmatprep.subr.mxu0 %v475_v0  ;;  %360 = vmatprep.mubr.msk.f32.mxu0 %vm476_vm0, %v475_v0  ;;  %v185_v3 = vld [vmem:[%s605_s1] sm:$0xff]  ;;  %vm267_vm2 = vcmask 523264   ;;  %p181_p7 = scmp.lt.s32.totalorder %s517_s16, 1  ;;  %vm285_vm3 = vcmask 516096  }
  0x30   : > { %405 = vset.pattern.permute.xlu0 %v477_v1  ;;  %v186_v4 = vld [vmem:[%s606_s2] sm:$0xff]  ;;  %359 = vmatpush3.msra.mxu0 %v184_v2 }
  0x31   : > { %189 = vperm.xlu0 %405, %v186_v4   ;;  %361 = vmatmul.mubr.msk.f32.vlgmr.msra.gmra.mxu0 %vm192_vm1, %v185_v3  ;;  %s619_s16 = smov (!%p181_p7, %s517_s16), 1 }
  0x32   : > { %s183_s30 = scalar_lea.vmem %s607_s3, %s619_s16 }
  0xac   : > { %v190_v5 = vpop.permute.xlu0 %189 }
  0xf1   : > { %v262_v6 = vpop.f32.mrf.mxu0 }
  0xf2   : > { %v263_v7 = vadd.f32 %v262_v6, %v190_v5 }
  0xf3   : > { %v362_v8 = vpop.f32.mrf.mxu0 }
  0xf4   : > { %v266_v9 = vmax.f32 %v263_v7, 0.0 }
  0xf6   : > { %v268_v10 = vsel %vm267_vm2, %v266_v9, -inf }
  0xf7   : > { %269 = vmax.xlane.f32.xlu0 %v268_v10 }
 0x180   : > { %v270_v11 = vpop.xlane.xlu0 %269 }
 0x181   : > { %v271_v12 = vmul.f32 %v270_v11, %v184_v2 }
 0x183   : > { %v272_v13 = vsel %vm267_vm2, %v271_v12, 0.0 }
 0x184   : > { %v273_v14 = vrot.slane %v272_v13, 4 }
 0x186   : > { %v274_v15 = vadd.f32 %v273_v14, %v272_v13 }
 0x188   : > { %v275_v16 = vrot.slane %v274_v15, 2 }
 0x18a   : > { %v276_v17 = vadd.f32 %v275_v16, %v274_v15 }
 0x18c   : > { %v277_v18 = vrot.slane %v276_v17, 1 }
 0x18e   : > { %v278_v19 = vadd.f32 %v277_v18, %v276_v17 }
 0x190   : > { %v279_v20 = vsub.f32 0.0, %v278_v19 }
 0x192   : > { %v280_v21 = vmul.f32 1.442695, %v279_v20 }
 0x194   : > { %406 = vpow2.f32 %v280_v21 }
 0x1a1   : > { %v407_v22 = vpop.eup %406 }
 0x1a2   : > { %v282_v23 = vadd.f32 1.0, %v407_v22 }
 0x1a4   : > { %408 = vrcp.f32 %v282_v23 }
 0x1b1   : > { %v409_v24 = vpop.eup %408 }
 0x1b2   : > { %286 = vst.msk [vmem:[%s183_s30] sm:$0x1] %vm285_vm3, %v409_v24 }
 0x1b3 PF: > { %p13_p8 = scmp.ge.s32.totalorder %s520_s17, 4   ;;  %s614_s12 = smov %s464_s13 }
 0x1b4   : > { %s615_s13 = smov %s468_s14  ;;  %s616_s14 = smov %s530_s20 }
 0x1b5   : > { %s617_s15 = smov %s520_s17  ;;  %15 = sbr.rel (!%p13_p8) target bundleno = 3 (0x3), region = 72 }
 0x1ba   :  { %304 = vsyncpa [#allocation3], 1 }
 0x1bb   :  { %306 = vsyncpa [#allocation3 + $0x1], 1 }

// kernel: gdpool_forward.3
= control target key start
LH: loop header
LB: loop body
LE: loop exit
PB: predicated region body
PF: predicated region fallthrough
CT: control target
= control target key end

     0   :  { %vm56_vm0 = vcmask 1042432   ;;  %vm49_vm1 = vcmask 23552   ;;  %vm136_vm2 = vcmask 518144   ;;  %vm150_vm3 = vcmask 523264   ;;  %s1447_s23 = smov 16   ;;  %s1719_s1 = inlined_call_operand.vmem [shape: f32[2,3,16], index: 1, kind: input, shape index: {}]   ;;  %s1720_s0 = inlined_call_operand.vmem [shape: f32[2,3,64], index: 0, kind: input, shape index: {}]   ;;  %s1721_s2 = inlined_call_operand.vmem [shape: f32[2,8,64], index: 2, kind: input, shape index: {}]   ;;  %s1722_s3 = inlined_call_operand.vmem [shape: f32[1,8,32], index: 3, kind: output, shape index: {}]  }
   0x1   :  { %v15_v0 = vld [vmem:[%s1719_s1] sm:$0x7]  ;;  %v148_v20 = vlaneseq  ;;  %v1445_v40 = vmov 0.0  }
   0x2   :  { %v14_v1 = vld [vmem:[%s1720_s0] sm:$0x7]  ;;  %17 = vxpose.xlu0.b32.start.end [1/1] (short) (narrow) %v15_v0, 16  ;;  %1381 = vmatprep.subr.mxu1 %v1445_v40 }
   0x3   :  { %1376 = vmatprep.subr.msk.mxu0 %vm56_vm0, %v14_v1  ;;  %v135_v4 = vmul.f32 %v14_v1, %v14_v1  ;;  %v1481_v21 = vand.u32 127, %v148_v20 }
   0x4   :  { %1377 = vmatpush3.msk.msra.mxu0 %vm56_vm0, %v14_v1 }
   0x5   :  { %v137_v5 = vsel %vm136_vm2, %v135_v4, 0.0  ;;  %1388 = vmatprep.subr.mxu0 %v1445_v40 }
   0x6   :  { %v138_v6 = vrot.slane %v137_v5, 4 }
   0x8   :  { %v139_v7 = vadd.f32 %v138_v6, %v137_v5 }
   0xa   :  { %v140_v8 = vrot.slane %v139_v7, 2 }
   0xc   :  { %v141_v9 = vadd.f32 %v140_v8, %v139_v7 }
   0xe   :  { %v142_v10 = vrot.slane %v141_v9, 1 }
  0x10   :  { %v143_v11 = vadd.f32 %v142_v10, %v141_v9 }
  0x7e   :  { %v33_v2 = vpop.trf.xlu0 }
  0x7f   :  { %1378 = vmatprep.mubr.msk.f32.mxu0 %vm49_vm1, %v33_v2 }
  0x82   :  { %v34_v3 = vpop.trf.xlu0 }
  0x83   :  { %1379 = vmatmul.mubr.msk.f32.vlgmr.msra.gmra.mxu0 %vm49_vm1, %v34_v3 }
 0x143   :  { %v1380_v12 = vpop.f32.mrf.mxu0 }
 0x144   :  { %v145_v13 = vmul.f32 2.0, %v1380_v12 }
 0x145   :  { %v126_v14 = vpop.f32.mrf.mxu0 }
 0x146   :  { %v147_v15 = vsub.f32 %v143_v11, %v145_v13  ;;  %v144_v16 = vmul.f32 2.0, %v126_v14 }
 0x148   :  { %v146_v17 = vsub.f32 %v143_v11, %v144_v16  ;;  %v154_v18 = vsel %vm150_vm3, %v147_v15, inf }
 0x149   :  { %155 = vmin.xlane.f32.xlu0 %v154_v18 }
 0x14a   :  { %v151_v19 = vsel %vm150_vm3, %v146_v17, inf }
 0x14b   :  { %152 = vmin.xlane.f32.xlu1 %v151_v19 }
 0x1d2   :  { %v156_v22 = vpop.xlane.xlu0 %155 }
 0x1d3   :  { %vm158_vm4 = vcmp.le.f32.partialorder %v147_v15, %v156_v22 }
 0x1d4   :  { %v160_v23 = vsel %vm158_vm4, %v1481_v21, 64  ;;  %v153_v24 = vpop.xlane.xlu1 %152 }
 0x1d5   :  { %v176_v25 = vsel %vm150_vm3, %v160_v23, 2147483647  ;;  %vm157_vm5 = vcmp.le.f32.partialorder %v146_v17, %v153_v24 }
 0x1d6   :  { %v159_v26 = vsel %vm157_vm5, %v1481_v21, 64  ;;  %v178_v27 = vshra.s32 %v176_v25, 16  ;;  %v177_v32 = vand.u32 65535, %v176_v25 }
 0x1d7   :  { %v161_v28 = vsel %vm150_vm3, %v159_v26, 2147483647 }
 0x1d8   :  { %v180_v29 = vcvt.s32.f32 %v178_v27  ;;  %v163_v30 = vshra.s32 %v161_v28, 16  ;;  %v179_v34 = vcvt.s32.f32 %v177_v32  ;;  %v162_v35 = vand.u32 65535, %v161_v28 }
 0x1da   :  { %181 = vmin.xlane.f32.xlu1 %v180_v29  ;;  %v165_v31 = vcvt.s32.f32 %v163_v30  ;;  %v164_v38 = vcvt.s32.f32 %v162_v35 }
 0x1de   :  { %166 = vmin.xlane.f32.xlu1 %v165_v31 }
 0x263   :  { %v182_v33 = vpop.xlane.xlu1 %181 }
 0x264   :  { %vm183_vm6 = vcmp.eq.f32.partialorder %v180_v29, %v182_v33  ;;  %v188_v41 = vcvt.f32.s32 %v182_v33 }
 0x265   :  { %v184_v36 = vsel %vm183_vm6, %v179_v34, inf }
 0x266   :  { %185 = vmin.xlane.f32.xlu1 %v184_v36  ;;  %v189_v43 = vshll.u32 %v188_v41, 16 }
 0x267   :  { %v167_v37 = vpop.xlane.xlu1 %166 }
 0x268   :  { %vm168_vm7 = vcmp.eq.f32.partialorder %v165_v31, %v167_v37  ;;  %v173_v44 = vcvt.f32.s32 %v167_v37 }
 0x269   :  { %v169_v39 = vsel %vm168_vm7, %v164_v38, inf }
 0x26a   :  { %170 = vmin.xlane.f32.xlu1 %v169_v39  ;;  %v174_v48 = vshll.u32 %v173_v44, 16 }
 0x2ef   :  { %v186_v42 = vpop.xlane.xlu1 %185 }
 0x2f0   :  { %v187_v45 = vcvt.f32.s32 %v186_v42 }
 0x2f2   :  { %v190_v46 = vadd.s32 %v189_v43, %v187_v45 }
 0x2f3   :  { %v171_v47 = vpop.xlane.xlu1 %170 }
 0x2f4   :  { %v172_v49 = vcvt.f32.s32 %v171_v47  ;;  %vm192_vm8 = vcmp.eq.s32.totalorder %v1481_v21, %v190_v46  ;;  %v1530_v47 = vld [vmem:[%s1721_s2] sm:$0xff] }
 0x2f5   :  { %v1301_v50 = vsel %vm192_vm8, 1.0, %v1445_v40  ;;  %v277_v51 = vsel %vm192_vm8, inf, %v147_v15  ;;  %vm1446_vm8 = vmmov 0  }
 0x2f6   :  { %v175_v52 = vadd.s32 %v174_v48, %v172_v49  ;;  %1382 = vmatpush3.xpose.msk.msra.mxu1 %vm150_vm3, %v1301_v50  ;;  %v281_v53 = vsel %vm150_vm3, %v277_v51, inf  ;;  %1385 = vmatprep.mubr.msk.f32.mxu1 %vm1446_vm8, %v1445_v40  ;;  %v1321_v48 = vld [vmem:[%s1719_s1 + $0x4] sm:$0x7] }
 0x2f7   :  { %282 = vmin.xlane.f32.xlu1 %v281_v53  ;;  %1383 = vmatprep.subr.mxu1 %v1445_v40 }
 0x2f8   :  { %vm191_vm9 = vcmp.eq.s32.totalorder %v1481_v21, %v175_v52  ;;  %1392 = vmatprep.mubr.msk.f32.mxu0 %vm1446_vm8, %v1445_v40 }
 0x2f9   :  { %v1300_v54 = vsel %vm191_vm9, 1.0, %v1445_v40  ;;  %v276_v55 = vsel %vm191_vm9, inf, %v146_v17 }
 0x2fa   :  { %1384 = vmatpush3.xpose.msk.msra.mxu1 %vm150_vm3, %v1300_v54  ;;  %v278_v56 = vsel %vm150_vm3, %v276_v55, inf }
 0x2fb   :  { %279 = vmin.xlane.f32.xlu1 %v278_v56  ;;  %1395 = vmatprep.subr.mxu1 %v1445_v40 }
 0x2fd   :  { %1386 = vmatmul.mubr.msk.f32.vlgmr.msra.gmra.mxu1 %vm150_vm3, %v1530_v47 }
 0x2fe   :  { %1399 = vmatprep.mubr.msk.f32.mxu1 %vm1446_vm8, %v1445_v40 }
 0x380   :  { %v283_v57 = vpop.xlane.xlu1 %282 }
 0x381   :  { %vm285_vm10 = vcmp.le.f32.partialorder %v277_v51, %v283_v57 }
 0x382   :  { %v287_v58 = vsel %vm285_vm10, %v1481_v21, 64 }
 0x383   :  { %v303_v59 = vsel %vm150_vm3, %v287_v58, 2147483647 }
 0x384   :  { %v280_v60 = vpop.xlane.xlu1 %279  ;;  %v305_v61 = vshra.s32 %v303_v59, 16  ;;  %v304_v3 = vand.u32 65535, %v303_v59 }
 0x385   :  { %vm284_vm11 = vcmp.le.f32.partialorder %v276_v55, %v280_v60  ;;  %v1320_v60 = vld [vmem:[%s1720_s0 + $0x4] sm:$0x7] }
 0x386   :  { %v286_v62 = vsel %vm284_vm11, %v1481_v21, 64  ;;  %v307_v63 = vcvt.s32.f32 %v305_v61  ;;  %v306_v5 = vcvt.s32.f32 %v304_v3 }
 0x387   :  { %v288_v0 = vsel %vm150_vm3, %v286_v62, 2147483647 }
 0x388   :  { %308 = vmin.xlane.f32.xlu1 %v307_v63  ;;  %v290_v1 = vshra.s32 %v288_v0, 16  ;;  %v289_v6 = vand.u32 65535, %v288_v0 }
 0x38a   :  { %v292_v2 = vcvt.s32.f32 %v290_v1  ;;  %v291_v9 = vcvt.s32.f32 %v289_v6  ;;  %v775_v6 = vmul.f32 %v1320_v60, %v1320_v60 }
 0x38c   :  { %293 = vmin.xlane.f32.xlu1 %v292_v2 }
 0x3bd   :  { %v272_v0 = vpop.f32.mrf.mxu1 }
 0x3bf   :  { %v1387_v3 = vpop.f32.mrf.mxu1 }
 0x411   :  { %v309_v4 = vpop.xlane.xlu1 %308 }
 0x412   :  { %vm310_vm12 = vcmp.eq.f32.partialorder %v307_v63, %v309_v4  ;;  %v315_v11 = vcvt.f32.s32 %v309_v4 }
 0x413   :  { %v311_v7 = vsel %vm310_vm12, %v306_v5, inf }
 0x414   :  { %312 = vmin.xlane.f32.xlu1 %v311_v7  ;;  %v316_v13 = vshll.u32 %v315_v11, 16 }
 0x415   :  { %v294_v8 = vpop.xlane.xlu1 %293 }
 0x416   :  { %vm295_vm13 = vcmp.eq.f32.partialorder %v292_v2, %v294_v8  ;;  %v300_v14 = vcvt.f32.s32 %v294_v8 }
 0x417   :  { %v296_v10 = vsel %vm295_vm13, %v291_v9, inf  ;;  %v776_v9 = vsel %vm136_vm2, %v775_v6, 0.0 }
 0x418   :  { %297 = vmin.xlane.f32.xlu1 %v296_v10  ;;  %v301_v18 = vshll.u32 %v300_v14, 16  ;;  %v777_v10 = vrot.slane %v776_v9, 4 }
 0x41a   :  { %v778_v11 = vadd.f32 %v777_v10, %v776_v9 }
 0x49d   :  { %v313_v12 = vpop.xlane.xlu1 %312 }
 0x49e   :  { %v314_v15 = vcvt.f32.s32 %v313_v12  ;;  %v779_v12 = vrot.slane %v778_v11, 2 }
 0x4a0   :  { %v317_v16 = vadd.s32 %v316_v13, %v314_v15  ;;  %v780_v13 = vadd.f32 %v779_v12, %v778_v11 }
 0x4a1   :  { %v298_v17 = vpop.xlane.xlu1 %297 }
 0x4a2   :  { %vm319_vm14 = vcmp.eq.s32.totalorder %v1481_v21, %v317_v16  ;;  %v299_v19 = vcvt.f32.s32 %v298_v17  ;;  %v781_v14 = vrot.slane %v780_v13, 1 }
 0x4a3   :  { %v1306_v20 = vsel %vm319_vm14, 1.0, %v1445_v40  ;;  %v1505_v22 = vsel %vm319_vm14, inf, %v277_v51 }
 0x4a4   :  { %v302_v23 = vadd.s32 %v301_v18, %v299_v19  ;;  %1389 = vmatpush3.xpose.msk.msra.mxu0 %vm150_vm3, %v1306_v20  ;;  %v406_v24 = vsel %vm150_vm3, %v1505_v22, inf  ;;  %v782_v15 = vadd.f32 %v781_v14, %v780_v13 }
 0x4a5   :  { %407 = vmin.xlane.f32.xlu1 %v406_v24  ;;  %1390 = vmatprep.subr.mxu0 %v1445_v40 }
 0x4a6   :  { %vm318_vm15 = vcmp.eq.s32.totalorder %v1481_v21, %v302_v23 }
 0x4a7   :  { %v1305_v25 = vsel %vm318_vm15, 1.0, %v1445_v40  ;;  %v1513_v26 = vsel %vm318_vm15, inf, %v276_v55 }
 0x4a8   :  { %1391 = vmatpush3.xpose.msk.msra.mxu0 %vm150_vm3, %v1305_v25  ;;  %v403_v27 = vsel %vm150_vm3, %v1513_v26, inf }
 0x4a9   :  { %404 = vmin.xlane.f32.xlu1 %v403_v27  ;;  %1402 = vmatprep.subr.mxu0 %v1445_v40 }
 0x4ab   :  { %1393 = vmatmul.mubr.msk.f32.vlgmr.msra.gmra.mxu0 %vm150_vm3, %v1530_v47 }
 0x4ac   :  { %1406 = vmatprep.mubr.msk.f32.mxu0 %vm1446_vm8, %v1445_v40 }
 0x52e   :  { %v408_v28 = vpop.xlane.xlu1 %407 }
 0x52f   :  { %vm410_vm4 = vcmp.le.f32.partialorder %v1505_v22, %v408_v28 }
 0x530   :  { %v412_v29 = vsel %vm410_vm4, %v1481_v21, 64 }
 0x531   :  { %v428_v30 = vsel %vm150_vm3, %v412_v29, 2147483647 }
 0x532   :  { %v405_v31 = vpop.xlane.xlu1 %404  ;;  %v430_v32 = vshra.s32 %v428_v30, 16  ;;  %v429_v38 = vand.u32 65535, %v428_v30 }
 0x533   :  { %vm409_vm5 = vcmp.le.f32.partialorder %v1513_v26, %v405_v31 }
 0x534   :  { %v411_v33 = vsel %vm409_vm5, %v1481_v21, 64  ;;  %v432_v34 = vcvt.s32.f32 %v430_v32  ;;  %v431_v41 = vcvt.s32.f32 %v429_v38 }
 0x535   :  { %v413_v35 = vsel %vm150_vm3, %v411_v33, 2147483647 }
 0x536   :  { %433 = vmin.xlane.f32.xlu1 %v432_v34  ;;  %v415_v36 = vshra.s32 %v413_v35, 16  ;;  %v414_v42 = vand.u32 65535, %v413_v35 }
 0x538   :  { %v417_v37 = vcvt.s32.f32 %v415_v36  ;;  %v416_v45 = vcvt.s32.f32 %v414_v42 }
 0x53a   :  { %418 = vmin.xlane.f32.xlu0 %v417_v37 }
 0x56b   :  { %v396_v1 = vpop.f32.mrf.mxu0 }
 0x56c   :  { %v400_v2 = vmax.f32 %v272_v0, %v396_v1 }
 0x56d   :  { %v1394_v4 = vpop.f32.mrf.mxu0 }
 0x5bf   :  { %v434_v39 = vpop.xlane.xlu1 %433 }
 0x5c0   :  { %vm435_vm6 = vcmp.eq.f32.partialorder %v432_v34, %v434_v39  ;;  %v440_v49 = vcvt.f32.s32 %v434_v39 }
 0x5c1   :  { %v436_v43 = vsel %vm435_vm6, %v431_v41, inf }
 0x5c2   :  { %437 = vmin.xlane.f32.xlu1 %v436_v43  ;;  %v441_v51 = vshll.u32 %v440_v49, 16 }
 0x5c3   :  { %v419_v44 = vpop.xlane.xlu0 %418 }
 0x5c4   :  { %vm420_vm7 = vcmp.eq.f32.partialorder %v417_v37, %v419_v44  ;;  %v425_v52 = vcvt.f32.s32 %v419_v44 }
 0x5c5   :  { %v421_v46 = vsel %vm420_vm7, %v416_v45, inf }
 0x5c6   :  { %422 = vmin.xlane.f32.xlu0 %v421_v46  ;;  %v426_v56 = vshll.u32 %v425_v52, 16 }
 0x5f5   :  { %659 = vxpose.xlu1.b32.start.end [1/1] (short) (narrow) %v1321_v48, 16 }
 0x64b   :  { %v438_v50 = vpop.xlane.xlu1 %437 }
 0x64c   :  { %v439_v53 = vcvt.f32.s32 %v438_v50 }
 0x64e   :  { %v1545_v54 = vadd.s32 %v441_v51, %v439_v53 }
 0x64f   :  { %v423_v55 = vpop.xlane.xlu0 %422 }
 0x650   :  { %vm444_vm9 = vcmp.eq.s32.totalorder %v1481_v21, %v1545_v54  ;;  %v424_v57 = vcvt.f32.s32 %v423_v55 }
 0x651   :  { %v1311_v58 = vsel %vm444_vm9, 1.0, %v1445_v40 }
 0x652   :  { %v1553_v59 = vadd.s32 %v426_v56, %v424_v57  ;;  %1396 = vmatpush3.xpose.msk.msra.mxu1 %vm150_vm3, %v1311_v58 }
 0x653   :  { %1397 = vmatprep.subr.mxu1 %v1445_v40 }
 0x654   :  { %vm443_vm10 = vcmp.eq.s32.totalorder %v1481_v21, %v1553_v59 }
 0x655   :  { %v1310_v61 = vsel %vm443_vm10, 1.0, %v1445_v40 }
 0x656   :  { %1398 = vmatpush3.xpose.msk.msra.mxu1 %vm150_vm3, %v1310_v61 }
 0x657   :  { %1409 = vmatprep.subr.msk.mxu1 %vm56_vm0, %v1320_v60 }
 0x659   :  { %1400 = vmatmul.mubr.msk.f32.vlgmr.msra.gmra.mxu1 %vm150_vm3, %v1530_v47 }
 0x65a   :  { %1410 = vmatpush3.msk.msra.mxu1 %vm56_vm0, %v1320_v60 }
 0x65b   :  { %1421 = vmatprep.subr.mxu1 %v1445_v40 }
 0x671   :  { %v675_v62 = vpop.trf.xlu1 }
 0x672   :  { %1411 = vmatprep.mubr.msk.f32.mxu1 %vm49_vm1, %v675_v62 }
 0x675   :  { %v676_v63 = vpop.trf.xlu1 }
 0x676   :  { %1412 = vmatmul.mubr.msk.f32.vlgmr.msra.gmra.mxu1 %vm49_vm1, %v676_v63 }
 0x677   :  { %1425 = vmatprep.mubr.msk.f32.mxu1 %vm1446_vm8, %v1445_v40 }
 0x719   :  { %v521_v5 = vpop.f32.mrf.mxu1 }
 0x71a   :  { %v1576_v7 = vmax.f32 %v400_v2, %v521_v5 }
 0x71b   :  { %v1401_v8 = vpop.f32.mrf.mxu1 }
 0x736   :  { %v1413_v16 = vpop.f32.mrf.mxu1 }
 0x737   :  { %v784_v17 = vmul.f32 2.0, %v1413_v16 }
 0x738   :  { %v766_v18 = vpop.f32.mrf.mxu1 }
 0x739   :  { %v786_v19 = vsub.f32 %v782_v15, %v784_v17  ;;  %v783_v20 = vmul.f32 2.0, %v766_v18 }
 0x73b   :  { %v785_v23 = vsub.f32 %v782_v15, %v783_v20  ;;  %v790_v24 = vsel %vm150_vm3, %v786_v19, inf }
 0x73c   :  { %791 = vmin.xlane.f32.xlu0 %v790_v24 }
 0x73d   :  { %v787_v25 = vsel %vm150_vm3, %v785_v23, inf }
 0x740   :  { %788 = vmin.xlane.f32.xlu0 %v787_v25 }
 0x7c5   :  { %v792_v27 = vpop.xlane.xlu0 %791 }
 0x7c6   :  { %vm794_vm0 = vcmp.le.f32.partialorder %v786_v19, %v792_v27 }
 0x7c7   :  { %v796_v28 = vsel %vm794_vm0, %v1481_v21, 64 }
 0x7c8   :  { %v812_v29 = vsel %vm150_vm3, %v796_v28, 2147483647 }
 0x7c9   :  { %v789_v30 = vpop.xlane.xlu0 %788  ;;  %v814_v31 = vshra.s32 %v812_v29, 16  ;;  %v813_v37 = vand.u32 65535, %v812_v29 }
 0x7ca   :  { %vm793_vm1 = vcmp.le.f32.partialorder %v785_v23, %v789_v30 }
 0x7cb   :  { %v795_v32 = vsel %vm793_vm1, %v1481_v21, 64  ;;  %v816_v33 = vcvt.s32.f32 %v814_v31  ;;  %v815_v39 = vcvt.s32.f32 %v813_v37  ;;  %v1618_v37 = vld [vmem:[%s1721_s2 + $0x8] sm:$0xff] }
 0x7cc   :  { %v797_v34 = vsel %vm150_vm3, %v795_v32, 2147483647 }
 0x7cd   :  { %817 = vmin.xlane.f32.xlu0 %v816_v33  ;;  %v799_v35 = vshra.s32 %v797_v34, 16  ;;  %v798_v41 = vand.u32 65535, %v797_v34 }
 0x7cf   :  { %v801_v36 = vcvt.s32.f32 %v799_v35  ;;  %v800_v44 = vcvt.s32.f32 %v798_v41 }
 0x7d1   :  { %802 = vmin.xlane.f32.xlu0 %v801_v36 }
 0x856   :  { %v818_v38 = vpop.xlane.xlu0 %817 }
 0x857   :  { %vm819_vm2 = vcmp.eq.f32.partialorder %v816_v33, %v818_v38  ;;  %v824_v46 = vcvt.f32.s32 %v818_v38 }
 0x858   :  { %v820_v42 = vsel %vm819_vm2, %v815_v39, inf }
 0x859   :  { %821 = vmin.xlane.f32.xlu0 %v820_v42  ;;  %v825_v49 = vshll.u32 %v824_v46, 16 }
 0x85a   :  { %v803_v43 = vpop.xlane.xlu0 %802 }
 0x85b   :  { %vm804_vm11 = vcmp.eq.f32.partialorder %v801_v36, %v803_v43  ;;  %v809_v50 = vcvt.f32.s32 %v803_v43 }
 0x85c   :  { %v805_v45 = vsel %vm804_vm11, %v800_v44, inf }
 0x85d   :  { %806 = vmin.xlane.f32.xlu0 %v805_v45  ;;  %v810_v55 = vshll.u32 %v809_v50, 16 }
 0x8e2   :  { %v822_v48 = vpop.xlane.xlu0 %821 }
 0x8e3   :  { %v823_v51 = vcvt.f32.s32 %v822_v48 }
 0x8e5   :  { %v1585_v52 = vadd.s32 %v825_v49, %v823_v51 }
 0x8e6   :  { %v807_v53 = vpop.xlane.xlu0 %806 }
 0x8e7   :  { %v808_v56 = vcvt.f32.s32 %v807_v53  ;;  %vm828_vm12 = vcmp.eq.s32.totalorder %v1481_v21, %v1585_v52 }
 0x8e8   :  { %v913_v57 = vsel %vm828_vm12, inf, %v786_v19 }
 0x8e9   :  { %v1592_v58 = vadd.s32 %v810_v55, %v808_v56  ;;  %v917_v60 = vsel %vm150_vm3, %v913_v57, inf }
 0x8ea   :  { %918 = vmin.xlane.f32.xlu0 %v917_v60 }
 0x8eb   :  { %vm827_vm13 = vcmp.eq.s32.totalorder %v1481_v21, %v1592_v58 }
 0x8ec   :  { %v912_v61 = vsel %vm827_vm13, inf, %v785_v23 }
 0x8ed   :  { %v914_v62 = vsel %vm150_vm3, %v912_v61, inf }
 0x8ee   :  { %915 = vmin.xlane.f32.xlu0 %v914_v62  ;;  %v527_v62 = vsel %vm444_vm9, inf, %v1505_v22 }
 0x973   :  { %v919_v63 = vpop.xlane.xlu0 %918 }
 0x974   :  { %vm921_vm14 = vcmp.le.f32.partialorder %v913_v57, %v919_v63  ;;  %v531_v63 = vsel %vm150_vm3, %v527_v62, inf }
 0x975   :  { %v923_v0 = vsel %vm921_vm14, %v1481_v21, 64 }
 0x976   :  { %v939_v1 = vsel %vm150_vm3, %v923_v0, 2147483647  ;;  %v526_v0 = vsel %vm443_vm10, inf, %v1513_v26 }
 0x977   :  { %v916_v2 = vpop.xlane.xlu0 %915  ;;  %v941_v3 = vshra.s32 %v939_v1, 16  ;;  %v940_v10 = vand.u32 65535, %v939_v1  ;;  %v528_v1 = vsel %vm150_vm3, %v526_v0, inf }
 0x978   :  { %vm920_vm15 = vcmp.le.f32.partialorder %v912_v61, %v916_v2 }
 0x979   :  { %v922_v4 = vsel %vm920_vm15, %v1481_v21, 64  ;;  %v943_v5 = vcvt.s32.f32 %v941_v3  ;;  %v942_v12 = vcvt.s32.f32 %v940_v10 }
 0x97a   :  { %v924_v6 = vsel %vm150_vm3, %v922_v4, 2147483647 }
 0x97b   :  { %944 = vmin.xlane.f32.xlu0 %v943_v5  ;;  %v926_v8 = vshra.s32 %v924_v6, 16  ;;  %v925_v13 = vand.u32 65535, %v924_v6 }
 0x97d   :  { %v928_v9 = vcvt.s32.f32 %v926_v8  ;;  %v927_v16 = vcvt.s32.f32 %v925_v13 }
 0x97f   :  { %929 = vmin.xlane.f32.xlu0 %v928_v9 }
 0xa04   :  { %v945_v11 = vpop.xlane.xlu0 %944 }
 0xa05   :  { %vm946_vm4 = vcmp.eq.f32.partialorder %v943_v5, %v945_v11  ;;  %v951_v18 = vcvt.f32.s32 %v945_v11 }
 0xa06   :  { %v947_v14 = vsel %vm946_vm4, %v942_v12, inf }
 0xa07   :  { %948 = vmin.xlane.f32.xlu0 %v947_v14  ;;  %v952_v20 = vshll.u32 %v951_v18, 16 }
 0xa08   :  { %v930_v15 = vpop.xlane.xlu0 %929 }
 0xa09   :  { %vm931_vm5 = vcmp.eq.f32.partialorder %v928_v9, %v930_v15  ;;  %v936_v23 = vcvt.f32.s32 %v930_v15 }
 0xa0a   :  { %v932_v17 = vsel %vm931_vm5, %v927_v16, inf }
 0xa0b   :  { %933 = vmin.xlane.f32.xlu0 %v932_v17  ;;  %v937_v28 = vshll.u32 %v936_v23, 16 }
 0xa90   :  { %v949_v19 = vpop.xlane.xlu0 %948 }
 0xa91   :  { %v950_v24 = vcvt.f32.s32 %v949_v19 }
 0xa93   :  { %v953_v25 = vadd.s32 %v952_v20, %v950_v24 }
 0xa94   :  { %v934_v27 = vpop.xlane.xlu0 %933 }
 0xa95   :  { %vm955_vm6 = vcmp.eq.s32.totalorder %v1481_v21, %v953_v25  ;;  %v935_v29 = vcvt.f32.s32 %v934_v27 }
 0xa96   :  { %v1332_v30 = vsel %vm955_vm6, 1.0, %v1445_v40  ;;  %v1038_v31 = vsel %vm955_vm6, inf, %v913_v57 }
 0xa97   :  { %v938_v32 = vadd.s32 %v937_v28, %v935_v29  ;;  %1422 = vmatpush3.xpose.msk.msra.mxu1 %vm150_vm3, %v1332_v30  ;;  %v1042_v33 = vsel %vm150_vm3, %v1038_v31, inf }
 0xa98   :  { %1043 = vmin.xlane.f32.xlu0 %v1042_v33  ;;  %1423 = vmatprep.subr.mxu1 %v1445_v40 }
 0xa99   :  { %vm954_vm7 = vcmp.eq.s32.totalorder %v1481_v21, %v938_v32 }
 0xa9a   :  { %v1331_v34 = vsel %vm954_vm7, 1.0, %v1445_v40  ;;  %v1037_v35 = vsel %vm954_vm7, inf, %v912_v61 }
 0xa9b   :  { %1424 = vmatpush3.xpose.msk.msra.mxu1 %vm150_vm3, %v1331_v34  ;;  %v1039_v36 = vsel %vm150_vm3, %v1037_v35, inf }
 0xa9c   :  { %1040 = vmin.xlane.f32.xlu1 %v1039_v36  ;;  %1435 = vmatprep.subr.mxu1 %v1445_v40 }
 0xa9e   :  { %1426 = vmatmul.mubr.msk.f32.vlgmr.msra.gmra.mxu1 %vm150_vm3, %v1618_v37 }
 0xa9f   :  { %1439 = vmatprep.mubr.msk.f32.mxu1 %vm1446_vm8, %v1445_v40 }
 0xb21   :  { %v1044_v38 = vpop.xlane.xlu0 %1043 }
 0xb22   :  { %vm1046_vm0 = vcmp.le.f32.partialorder %v1038_v31, %v1044_v38 }
 0xb23   :  { %v1048_v39 = vsel %vm1046_vm0, %v1481_v21, 64 }
 0xb24   :  { %v1064_v41 = vsel %vm150_vm3, %v1048_v39, 2147483647 }
 0xb25   :  { %v1041_v42 = vpop.xlane.xlu1 %1040  ;;  %v1066_v43 = vshra.s32 %v1064_v41, 16  ;;  %v1065_v50 = vand.u32 65535, %v1064_v41 }
 0xb26   :  { %vm1045_vm1 = vcmp.le.f32.partialorder %v1037_v35, %v1041_v42 }
 0xb27   :  { %v1047_v44 = vsel %vm1045_vm1, %v1481_v21, 64  ;;  %v1068_v45 = vcvt.s32.f32 %v1066_v43  ;;  %v1067_v53 = vcvt.s32.f32 %v1065_v50 }
 0xb28   :  { %v1049_v46 = vsel %vm150_vm3, %v1047_v44, 2147483647 }
 0xb29   :  { %1069 = vmin.xlane.f32.xlu0 %v1068_v45  ;;  %v1051_v48 = vshra.s32 %v1049_v46, 16  ;;  %v1050_v55 = vand.u32 65535, %v1049_v46 }
 0xb2b   :  { %v1053_v49 = vcvt.s32.f32 %v1051_v48  ;;  %v1052_v60 = vcvt.s32.f32 %v1050_v55 }
 0xb2d   :  { %1054 = vmin.xlane.f32.xlu0 %v1053_v49 }
 0xb5e   :  { %v1032_v58 = vpop.f32.mrf.mxu1 }
 0xbb2   :  { %v1070_v51 = vpop.xlane.xlu0 %1069 }
 0xbb3   :  { %vm1071_vm2 = vcmp.eq.f32.partialorder %v1068_v45, %v1070_v51  ;;  %v1076_v2 = vcvt.f32.s32 %v1070_v51 }
 0xbb4   :  { %v1072_v56 = vsel %vm1071_vm2, %v1067_v53, inf }
 0xbb5   :  { %1073 = vmin.xlane.f32.xlu0 %v1072_v56  ;;  %v1077_v4 = vshll.u32 %v1076_v2, 16 }
 0xbb6   :  { %v1055_v57 = vpop.xlane.xlu0 %1054 }
 0xbb7   :  { %vm1056_vm11 = vcmp.eq.f32.partialorder %v1053_v49, %v1055_v57  ;;  %v1061_v5 = vcvt.f32.s32 %v1055_v57 }
 0xbb8   :  { %v1057_v61 = vsel %vm1056_vm11, %v1052_v60, inf }
 0xbb9   :  { %1058 = vmin.xlane.f32.xlu0 %v1057_v61  ;;  %v1062_v22 = vshll.u32 %v1061_v5, 16 }
 0xbbd   :  { %532 = vmin.xlane.f32.xlu0 %v531_v63 }
 0xbc1   :  { %529 = vmin.xlane.f32.xlu0 %v528_v1 }
 0xc3e   :  { %v1074_v3 = vpop.xlane.xlu0 %1073 }
 0xc3f   :  { %v1075_v6 = vcvt.f32.s32 %v1074_v3 }
 0xc41   :  { %v1638_v8 = vadd.s32 %v1077_v4, %v1075_v6 }
 0xc42   :  { %v1059_v54 = vpop.xlane.xlu0 %1058 }
 0xc43   :  { %v1060_v9 = vcvt.f32.s32 %v1059_v54  ;;  %vm1080_vm9 = vcmp.eq.s32.totalorder %v1481_v21, %v1638_v8  ;;  %v1327_v54 = vsel %vm828_vm12, 1.0, %v1445_v40  ;;  %v1427_v8 = vpop.f32.mrf.mxu1 }
 0xc44   :  { %v1163_v26 = vsel %vm1080_vm9, inf, %v1038_v31 }
 0xc45   :  { %v1645_v59 = vadd.s32 %v1062_v22, %v1060_v9  ;;  %v1167_v10 = vsel %vm150_vm3, %v1163_v26, inf  ;;  %v1326_v22 = vsel %vm827_vm13, 1.0, %v1445_v40  ;;  %vm651_vm13 = vcmask 130048  }
 0xc46   :  { %1168 = vmin.xlane.f32.xlu0 %v1167_v10  ;;  %v533_v11 = vpop.xlane.xlu0 %532 }
 0xc47   :  { %vm535_vm10 = vcmp.le.f32.partialorder %v527_v62, %v533_v11  ;;  %vm1079_vm14 = vcmp.eq.s32.totalorder %v1481_v21, %v1645_v59 }
 0xc48   :  { %v537_v12 = vsel %vm535_vm10, %v1481_v21, 64  ;;  %v1162_v13 = vsel %vm1079_vm14, inf, %v1037_v35  ;;  %v1336_v52 = vsel %vm1079_vm14, 1.0, %v1445_v40 }
 0xc49   :  { %v553_v14 = vsel %vm150_vm3, %v537_v12, 2147483647  ;;  %v1164_v15 = vsel %vm150_vm3, %v1162_v13, inf }
 0xc4a   :  { %1165 = vmin.xlane.f32.xlu0 %v1164_v15  ;;  %v530_v16 = vpop.xlane.xlu0 %529  ;;  %v555_v17 = vshra.s32 %v553_v14, 16  ;;  %v554_v31 = vand.u32 65535, %v553_v14 }
 0xc4b   :  { %vm534_vm15 = vcmp.le.f32.partialorder %v526_v0, %v530_v16 }
 0xc4c   :  { %v536_v18 = vsel %vm534_vm15, %v1481_v21, 64  ;;  %v557_v19 = vcvt.s32.f32 %v555_v17  ;;  %v556_v38 = vcvt.s32.f32 %v554_v31 }
 0xc4d   :  { %v538_v20 = vsel %vm150_vm3, %v536_v18, 2147483647 }
 0xc4e   :  { %558 = vmin.xlane.f32.xlu0 %v557_v19  ;;  %v540_v23 = vshra.s32 %v538_v20, 16  ;;  %v539_v39 = vand.u32 65535, %v538_v20 }
 0xc50   :  { %v542_v24 = vcvt.s32.f32 %v540_v23  ;;  %v541_v44 = vcvt.s32.f32 %v539_v39 }
 0xc52   :  { %543 = vmin.xlane.f32.xlu0 %v542_v24 }
 0xccf   :  { %v1169_v25 = vpop.xlane.xlu0 %1168 }
 0xcd0   :  { %vm1171_vm4 = vcmp.le.f32.partialorder %v1163_v26, %v1169_v25 }
 0xcd1   :  { %v1173_v27 = vsel %vm1171_vm4, %v1481_v21, 64 }
 0xcd2   :  { %v1189_v28 = vsel %vm150_vm3, %v1173_v27, 2147483647 }
 0xcd3   :  { %v1166_v29 = vpop.xlane.xlu0 %1165  ;;  %v1191_v30 = vshra.s32 %v1189_v28, 16  ;;  %v1190_v46 = vand.u32 65535, %v1189_v28 }
 0xcd4   :  { %vm1170_vm5 = vcmp.le.f32.partialorder %v1162_v13, %v1166_v29 }
 0xcd5   :  { %v1172_v32 = vsel %vm1170_vm5, %v1481_v21, 64  ;;  %v1193_v33 = vcvt.s32.f32 %v1191_v30  ;;  %v1192_v49 = vcvt.s32.f32 %v1190_v46 }
 0xcd6   :  { %v1174_v34 = vsel %vm150_vm3, %v1172_v32, 2147483647 }
 0xcd7   :  { %1194 = vmin.xlane.f32.xlu0 %v1193_v33  ;;  %v559_v35 = vpop.xlane.xlu0 %558  ;;  %v1176_v36 = vshra.s32 %v1174_v34, 16  ;;  %v1175_v50 = vand.u32 65535, %v1174_v34 }
 0xcd8   :  { %vm560_vm6 = vcmp.eq.f32.partialorder %v557_v19, %v559_v35  ;;  %v565_v51 = vcvt.f32.s32 %v559_v35 }
 0xcd9   :  { %v1178_v41 = vcvt.s32.f32 %v1176_v36  ;;  %v561_v42 = vsel %vm560_vm6, %v556_v38, inf  ;;  %v1177_v57 = vcvt.s32.f32 %v1175_v50 }
 0xcda   :  { %v566_v60 = vshll.u32 %v565_v51, 16 }
 0xcdb   :  { %1179 = vmin.xlane.f32.xlu1 %v1178_v41  ;;  %562 = vmin.xlane.f32.xlu0 %v561_v42  ;;  %v544_v43 = vpop.xlane.xlu0 %543 }
 0xcdc   :  { %vm545_vm7 = vcmp.eq.f32.partialorder %v542_v24, %v544_v43  ;;  %v550_v61 = vcvt.f32.s32 %v544_v43 }
 0xcdd   :  { %v546_v45 = vsel %vm545_vm7, %v541_v44, inf }
 0xcde   :  { %v551_v2 = vshll.u32 %v550_v61, 16 }
 0xcdf   :  { %547 = vmin.xlane.f32.xlu1 %v546_v45 }
 0xd60   :  { %v1195_v48 = vpop.xlane.xlu0 %1194 }
 0xd61   :  { %vm1196_vm0 = vcmp.eq.f32.partialorder %v1193_v33, %v1195_v48  ;;  %v1201_v9 = vcvt.f32.s32 %v1195_v48 }
 0xd62   :  { %v1197_v53 = vsel %vm1196_vm0, %v1192_v49, inf }
 0xd63   :  { %1198 = vmin.xlane.f32.xlu0 %v1197_v53  ;;  %v1202_v10 = vshll.u32 %v1201_v9, 16 }
 0xd64   :  { %v1180_v55 = vpop.xlane.xlu1 %1179  ;;  %v563_v56 = vpop.xlane.xlu0 %562 }
 0xd65   :  { %v564_v62 = vcvt.f32.s32 %v563_v56  ;;  %vm1181_vm1 = vcmp.eq.f32.partialorder %v1178_v41, %v1180_v55  ;;  %v1186_v11 = vcvt.f32.s32 %v1180_v55 }
 0xd66   :  { %v1182_v63 = vsel %vm1181_vm1, %v1177_v57, inf }
 0xd67   :  { %v567_v0 = vadd.s32 %v566_v60, %v564_v62  ;;  %1183 = vmin.xlane.f32.xlu1 %v1182_v63  ;;  %v1187_v15 = vshll.u32 %v1186_v11, 16 }
 0xd68   :  { %v548_v1 = vpop.xlane.xlu1 %547 }
 0xd69   :  { %vm569_vm2 = vcmp.eq.s32.totalorder %v1481_v21, %v567_v0  ;;  %v549_v3 = vcvt.f32.s32 %v548_v1 }
 0xd6a   :  { %v1316_v4 = vsel %vm569_vm2, 1.0, %v1445_v40 }
 0xd6b   :  { %v552_v5 = vadd.s32 %v551_v2, %v549_v3  ;;  %1403 = vmatpush3.xpose.msk.msra.mxu0 %vm150_vm3, %v1316_v4 }
 0xd6c   :  { %1404 = vmatprep.subr.mxu0 %v1445_v40 }
 0xd6d   :  { %vm568_vm11 = vcmp.eq.s32.totalorder %v1481_v21, %v552_v5 }
 0xd6e   :  { %v1315_v6 = vsel %vm568_vm11, 1.0, %v1445_v40 }
 0xd6f   :  { %1405 = vmatpush3.xpose.msk.msra.mxu0 %vm150_vm3, %v1315_v6 }
 0xd70   :  { %1414 = vmatprep.subr.mxu0 %v1445_v40 }
 0xd72   :  { %1407 = vmatmul.mubr.msk.f32.vlgmr.msra.gmra.mxu0 %vm150_vm3, %v1530_v47  ;;  %v1337_v47 = vsel %vm1080_vm9, 1.0, %v1445_v40 }
 0xd73   :  { %1415 = vmatpush3.xpose.msk.msra.mxu0 %vm150_vm3, %v1327_v54  ;;  %1418 = vmatprep.mubr.msk.f32.mxu0 %vm1446_vm8, %v1445_v40 }
 0xd74   :  { %1416 = vmatprep.subr.mxu0 %v1445_v40 }
 0xd77   :  { %1417 = vmatpush3.xpose.msk.msra.mxu0 %vm150_vm3, %v1326_v22 }
 0xd78   :  { %1428 = vmatprep.subr.mxu0 %v1445_v40 }
 0xd7a   :  { %1419 = vmatmul.mubr.msk.f32.vlgmr.msra.gmra.mxu0 %vm150_vm3, %v1618_v37 }
 0xd7b   :  { %1429 = vmatpush3.xpose.msk.msra.mxu0 %vm150_vm3, %v1337_v47  ;;  %1432 = vmatprep.mubr.msk.f32.mxu0 %vm1446_vm8, %v1445_v40 }
 0xd7c   :  { %1430 = vmatprep.subr.mxu0 %v1445_v40 }
 0xd7f   :  { %1431 = vmatpush3.xpose.msk.msra.mxu0 %vm150_vm3, %v1336_v52 }
 0xd82   :  { %1433 = vmatmul.mubr.msk.f32.vlgmr.msra.gmra.mxu0 %vm150_vm3, %v1618_v37 }
 0xdec   :  { %v1199_v26 = vpop.xlane.xlu0 %1198 }
 0xded   :  { %v1200_v12 = vcvt.f32.s32 %v1199_v26 }
 0xdef   :  { %v1203_v13 = vadd.s32 %v1202_v10, %v1200_v12 }
 0xdf0   :  { %v1184_v14 = vpop.xlane.xlu1 %1183 }
 0xdf1   :  { %vm1205_vm8 = vcmp.eq.s32.totalorder %v1481_v21, %v1203_v13  ;;  %v1185_v16 = vcvt.f32.s32 %v1184_v14 }
 0xdf2   :  { %v1342_v59 = vsel %vm1205_vm8, 1.0, %v1445_v40 }
 0xdf3   :  { %v1188_v17 = vadd.s32 %v1187_v15, %v1185_v16  ;;  %1436 = vmatpush3.xpose.msk.msra.mxu1 %vm150_vm3, %v1342_v59 }
 0xdf4   :  { %1437 = vmatprep.subr.mxu1 %v1445_v40 }
 0xdf5   :  { %vm1204_vm12 = vcmp.eq.s32.totalorder %v1481_v21, %v1188_v17 }
 0xdf6   :  { %v1341_v18 = vsel %vm1204_vm12, 1.0, %v1445_v40 }
 0xdf7   :  { %1438 = vmatpush3.xpose.msk.msra.mxu1 %vm150_vm3, %v1341_v18 }
 0xdfa   :  { %1440 = vmatmul.mubr.msk.f32.vlgmr.msra.gmra.mxu1 %vm150_vm3, %v1618_v37  ;;  %vm1291_vm3 = vcmask 261248  }
 0xe32   :  { %v646_v19 = vpop.f32.mrf.mxu0 }
 0xe33   :  { %v650_v20 = vmax.f32 %v1576_v7, %v646_v19 }
 0xe34   :  { %v1408_v23 = vpop.f32.mrf.mxu0 }
 0xe35   :  { %652 = vst.msk [vmem:[%s1722_s3] sm:$0xff] %vm651_vm13, %v650_v20 }
 0xe3a   :  { %v908_v24 = vpop.f32.mrf.mxu0 }
 0xe3b   :  { %v1036_v27 = vmax.f32 %v908_v24, %v1032_v58 }
 0xe3c   :  { %v1420_v25 = vpop.f32.mrf.mxu0 }
 0xe42   :  { %v1157_v21 = vpop.f32.mrf.mxu0 }
 0xe43   :  { %v1161_v28 = vmax.f32 %v1036_v27, %v1157_v21 }
 0xe44   :  { %v1434_v40 = vpop.f32.mrf.mxu0 }
 0xeba   :  { %v1282_v29 = vpop.f32.mrf.mxu1 }
 0xebb   :  { %v1286_v30 = vmax.f32 %v1161_v28, %v1282_v29 }
 0xebc   :  { %v1441_v31 = vpop.f32.mrf.mxu1 }
 0xebd   :  { %1288 = vrot.lane.b32.xlu0 %v1286_v30, %s1447_s23 }
 0xf2f   :  { %v1289_v37 = vpop.permute.xlu0 %1288 }
 0xf30   :  { %1292 = vst.msk [vmem:[%s1722_s3] sm:$0xff] %vm1291_vm3, %v1289_v37 }

</bundles_post_ra>
